<compile_context>
chip_gen: v5e
topology: v5e:2x2
jax: 0.10.0
libtpu: 0.0.40
codegen_flags: <defaults>
</compile_context>

<pallas_src>
import functools

import jax
import jax.numpy as jnp
import numpy as np
from jax.experimental import pallas as pl
from jax.experimental.pallas import tpu as pltpu

NEG_SLOPE = 0.01  # F.leaky_relu default negative_slope


def _leaky_relu(x):
    return jnp.where(x > 0, x, NEG_SLOPE * x)


# ---------------------------------------------------------------------------
# Fused forward kernel.  Grid axis 0 = GNN layer (sequential, "arbitrary").
# ---------------------------------------------------------------------------
def gnn_fused_kernel(x_ref, lin_w_ref, lin_b_ref,               # atom embedding
                     ea_ref, ssrc_hbm, adstT_hbm, dinv_ref,     # edges / gather / scatter
                     repm_ref, sums_ref,                        # constant RepM / SumS
                     pool_ref, pw_ref, pb_ref,                  # graph readout + pred head
                     w1_ref, b1_ref, w2s_ref, wr_ref, shift_ref,  # per-layer params
                     o_ref,                                     # output [G, 1]
                     h_scr, ssrc_vmem, adstT_vmem, dma_sem,     # scratch
                     *jk_scr,                                   # optional JK accumulator
                     num_layer, jk_mode, apply_dinv):
    layer = pl.program_id(0)

    # ---- layer 0: DMA the constant gather/scatter matrices once (single buffer),
    #      compute the atom embedding, init the JK accumulator ----
    @pl.when(layer == 0)
    def _():
        cp_s = pltpu.make_async_copy(ssrc_hbm, ssrc_vmem, dma_sem.at[0])
        cp_a = pltpu.make_async_copy(adstT_hbm, adstT_vmem, dma_sem.at[1])
        cp_s.start()
        cp_a.start()
        cp_s.wait()
        cp_a.wait()
        emb = jnp.dot(x_ref[...], lin_w_ref[...],
                      preferred_element_type=jnp.float32) + lin_b_ref[...]
        h_scr[...] = _leaky_relu(emb)
        if jk_mode in ("sum", "mean"):
            jk_scr[0][...] = jnp.zeros(jk_scr[0].shape, jk_scr[0].dtype)

    h_in = h_scr[...]                                   # [N, C] f32 == x_list[layer]
    if jk_mode in ("sum", "mean"):                      # torch JK sums x_list[0..L-1]
        jk_scr[0][...] = jk_scr[0][...] + h_in
    h_bf = h_in.astype(jnp.bfloat16)

    # ---- mes_nn first layer (padded hidden width; one padded unit is a constant
    #      1.0 that carries the folded conv bias b2) ----
    hh = jnp.dot(ea_ref[...], w1_ref[0],
                 preferred_element_type=jnp.float32) + b1_ref[0]
    hh = jnp.maximum(hh, 0.0)                           # [E, M]

    # ---- gather source node features via one-hot matmul (MXU) ----
    # TODO(synk): for large graphs replace ssrc/adstT one-hot matmuls with an
    # edge-tiled grid axis + scalar-prefetched src/dst indices (index-driven
    # gather + VMEM scatter accumulator); the dense form is O(E*N*C) FLOPs.
    x_src = jnp.dot(ssrc_vmem[...], h_bf,
                    preferred_element_type=jnp.float32)  # [E, C]

    # ---- per-edge matvec as a contraction over the mes_nn hidden dim ----
    t = jnp.dot(x_src.astype(jnp.bfloat16), w2s_ref[0],
                preferred_element_type=jnp.float32)      # [E, M*C]  (BN scale folded)
    hh_rep = jnp.dot(hh.astype(jnp.bfloat16), repm_ref[...],
                     preferred_element_type=jnp.float32) # [E, M*C]
    prod = hh_rep * t                                    # lane-dense [E, 256] VPU
    msg = jnp.dot(prod.astype(jnp.bfloat16), sums_ref[...],
                  preferred_element_type=jnp.float32)    # [E, C]

    # ---- scatter add (or mean) to destination nodes ----
    aggr = jnp.dot(adstT_vmem[...], msg.astype(jnp.bfloat16),
                   preferred_element_type=jnp.float32)   # [N, C]
    if apply_dinv:                                       # only for aggr == 'mean'
        aggr = aggr * dinv_ref[...]

    # ---- root transform (BN scale folded) + folded bias/BN shift ----
    out = aggr + jnp.dot(h_bf, wr_ref[0],
                         preferred_element_type=jnp.float32) + shift_ref[0]

    # ---- activation on all but the last layer (dropout in eval == identity) ----
    @pl.when(layer != num_layer - 1)
    def _():
        h_scr[...] = _leaky_relu(out)

    # ---- last layer: JK combine, graph readout (scatter_add), prediction head ----
    @pl.when(layer == num_layer - 1)
    def _():
        if jk_mode == "last":
            h_fin = out
        elif jk_mode == "sum":
            h_fin = jk_scr[0][...]
        else:  # "mean"
            h_fin = jk_scr[0][...] * (1.0 / num_layer)
        pooled = jnp.dot(pool_ref[...], h_fin.astype(jnp.bfloat16),
                         preferred_element_type=jnp.float32)     # [G, C]
        o_ref[...] = jnp.dot(pooled, pw_ref[...],
                             preferred_element_type=jnp.float32) + pb_ref[...]


# ---------------------------------------------------------------------------
# Parameter init (deterministic, PyTorch-Linear-style uniform)
# ---------------------------------------------------------------------------
def init_params(key, num_layer, node_dim, edge_dim, conv_dim, neurons_message=5):
    def lin(k, fan_in, fan_out):
        k1, k2 = jax.random.split(k)
        bound = 1.0 / np.sqrt(fan_in)
        w = jax.random.uniform(k1, (fan_in, fan_out), jnp.float32, -bound, bound)
        b = jax.random.uniform(k2, (1, fan_out), jnp.float32, -bound, bound)
        return w, b

    keys = jax.random.split(key, num_layer + 2)
    p = {}
    p["lin_w"], p["lin_b"] = lin(keys[0], node_dim, conv_dim)
    p["layers"] = []
    eps = 1e-5
    for layer in range(num_layer):
        k = jax.random.split(keys[1 + layer], 3)
        w1, b1 = lin(k[0], edge_dim, neurons_message)
        w2, b2 = lin(k[1], neurons_message, conv_dim * conv_dim)
        w_root = jax.random.uniform(k[2], (conv_dim, conv_dim), jnp.float32,
                                    -1.0 / np.sqrt(conv_dim), 1.0 / np.sqrt(conv_dim))
        b_conv = jnp.zeros((1, conv_dim), jnp.float32)
        # BatchNorm1d fresh-module defaults: gamma=1, beta=0, running_mean=0, running_var=1
        gamma = jnp.ones((1, conv_dim), jnp.float32)
        beta = jnp.zeros((1, conv_dim), jnp.float32)
        rm = jnp.zeros((1, conv_dim), jnp.float32)
        rv = jnp.ones((1, conv_dim), jnp.float32)
        scale = gamma / jnp.sqrt(rv + eps)
        shift = beta - rm * scale
        p["layers"].append(dict(w1=w1, b1=b1, w2=w2, b2=b2, w_root=w_root,
                                b_conv=b_conv, bn_scale=scale, bn_shift=shift))
    p["pred_w"], p["pred_b"] = lin(keys[-1], conv_dim, 1)
    return p


# ---------------------------------------------------------------------------
# Full forward: fold / stack parameters host-side, ONE pallas_call.
# ---------------------------------------------------------------------------
def gnn_forward(params, x, edge_index, edge_attr, batch, num_graphs,
                num_layer, JK="last", graph_pooling="add"):
    n, _ = x.shape
    e = edge_attr.shape[0]
    c = params["lin_w"].shape[1]
    g = num_graphs
    src, dst = edge_index[0], edge_index[1]

    if graph_pooling == "max":
        # TODO(synk): 'max' edge aggregation needs a segment-max kernel; not implemented.
        raise NotImplementedError("graph_pooling='max' aggregation not implemented")

    # One-hot gather/scatter matrices (0/1 -> exact in bf16); DMA'd once into VMEM
    # scratch inside the kernel (single-buffered).
    s_src = jax.nn.one_hot(src, n, dtype=jnp.bfloat16)            # [E, N] gather
    a_dst_t = jax.nn.one_hot(dst, n, dtype=jnp.bfloat16).T        # [N, E] scatter-add
    if graph_pooling == "mean":
        deg = jnp.zeros((n, 1), jnp.float32).at[dst].add(1.0)
        deg_inv = 1.0 / jnp.maximum(deg, 1.0)                     # keep scaling in f32
        apply_dinv = True
    else:  # 'add'
        deg_inv = jnp.ones((n, 1), jnp.float32)                   # unused in kernel
        apply_dinv = False
    pool_mat = jax.nn.one_hot(batch, g, dtype=jnp.bfloat16).T     # [G, N], 0/1 exact

    # mes_nn hidden width padded up: room for the folded-bias constant-one unit,
    # rounded to a multiple of 8.
    m = params["layers"][0]["w1"].shape[1]
    m_pad = ((m + 1 + 7) // 8) * 8

    # Constant replicate / strided-sum matrices for the hidden-dim contraction.
    rep_np = np.zeros((m_pad, m_pad * c), np.float32)
    for mm in range(m_pad):
        rep_np[mm, mm * c:(mm + 1) * c] = 1.0
    rep_m = jnp.asarray(rep_np, jnp.bfloat16)                     # [M, M*C]  0/1 exact
    sum_s = jnp.asarray(np.tile(np.eye(c, dtype=np.float32), (m_pad, 1)),
                        jnp.bfloat16)                             # [M*C, C]  0/1 exact

    # Per-layer parameter folding + stacking.
    w1_l, b1_l, w2s_l, wr_l, shift_l = [], [], [], [], []
    for lp in params["layers"]:
        s = lp["bn_scale"]                                        # [1, C]
        # w1 padded with zero columns; one padded b1 entry is 1.0 -> constant hidden
        # unit that carries the folded conv bias b2.
        w1p = jnp.pad(lp["w1"], ((0, 0), (0, m_pad - m)))
        b1p = jnp.concatenate(
            [lp["b1"], jnp.ones((1, 1), jnp.float32),
             jnp.zeros((1, m_pad - m - 1), jnp.float32)], axis=1)
        w2_aug = jnp.concatenate([lp["w2"], lp["b2"]], axis=0)    # [M+1, C*C]
        w2_aug = jnp.pad(w2_aug, ((0, m_pad - (m + 1)), (0, 0)))  # [M_pad, C*C]
        w2r = w2_aug.reshape(m_pad, c, c) * s[0][None, None, :]   # fold BN scale over o
        w2s = jnp.transpose(w2r, (1, 0, 2)).reshape(c, m_pad * c) # [C, M_pad*C]
        wr = lp["w_root"] * s                                     # fold BN scale
        shift = lp["b_conv"] * s + lp["bn_shift"]                 # folded bias + BN shift
        w1_l.append(w1p); b1_l.append(b1p); w2s_l.append(w2s)
        wr_l.append(wr); shift_l.append(shift)

    w1 = jnp.stack(w1_l).astype(jnp.bfloat16)      # [L, De, M_pad]
    b1 = jnp.stack(b1_l)                           # [L, 1, M_pad]   f32
    w2s = jnp.stack(w2s_l).astype(jnp.bfloat16)    # [L, C, M_pad*C]
    w_root = jnp.stack(wr_l).astype(jnp.bfloat16)  # [L, C, C]
    shift = jnp.stack(shift_l)                     # [L, 1, C]       f32

    ea_bf = edge_attr.astype(jnp.bfloat16)

    # Full-array blocks with constant index maps (fetched once across the layer grid).
    def full2d(a):
        return pl.BlockSpec(a.shape, lambda l: (0, 0))

    # Per-layer stacked params, sliced by the layer grid axis.
    def per_layer(a):
        return pl.BlockSpec((1,) + a.shape[1:], lambda l: (l, 0, 0))

    # Per-generation VMEM budget: ~3/4 of physical capacity (96 MiB on v5e/v6e,
    # 48 MiB on v7x), safe fallback if the query is unavailable.
    try:
        vmem_cap = pltpu.get_tpu_info().vmem_capacity_bytes
    except Exception:  # pragma: no cover - conservative fallback
        vmem_cap = 64 * 1024 * 1024
    vmem_limit = min((vmem_cap * 3) // 4, 112 * 1024 * 1024)

    scratch_shapes = [
        pltpu.VMEM((n, c), jnp.float32),          # h (node features, resident)
        pltpu.VMEM((e, n), jnp.bfloat16),         # gather one-hot (single buffer)
        pltpu.VMEM((n, e), jnp.bfloat16),         # scatter one-hot (single buffer)
        pltpu.SemaphoreType.DMA((2,)),            # DMA completion sems
    ]
    if JK in ("sum", "mean"):
        scratch_shapes.append(pltpu.VMEM((n, c), jnp.float32))   # JK accumulator

    kern = functools.partial(gnn_fused_kernel, num_layer=num_layer,
                             jk_mode=JK, apply_dinv=apply_dinv)
    return pl.pallas_call(
        kern,
        out_shape=jax.ShapeDtypeStruct((g, 1), jnp.float32),
        grid_spec=pltpu.PrefetchScalarGridSpec(
            num_scalar_prefetch=0,
            grid=(num_layer,),
            in_specs=[
                full2d(x), full2d(params["lin_w"]), full2d(params["lin_b"]),
                full2d(ea_bf),
                pl.BlockSpec(memory_space=pl.ANY),   # gather one-hot stays in HBM
                pl.BlockSpec(memory_space=pl.ANY),   # scatter one-hot stays in HBM
                full2d(deg_inv),
                full2d(rep_m), full2d(sum_s),
                full2d(pool_mat), full2d(params["pred_w"]), full2d(params["pred_b"]),
                per_layer(w1), per_layer(b1), per_layer(w2s),
                per_layer(w_root), per_layer(shift),
            ],
            out_specs=pl.BlockSpec((g, 1), lambda l: (0, 0)),
            scratch_shapes=scratch_shapes,
        ),
        compiler_params=pltpu.CompilerParams(
            dimension_semantics=("arbitrary",),      # layers carry state sequentially
            vmem_limit_bytes=int(vmem_limit),
        ),
    )(x, params["lin_w"], params["lin_b"],
      ea_bf, s_src, a_dst_t, deg_inv,
      rep_m, sum_s,
      pool_mat, params["pred_w"], params["pred_b"],
      w1, b1, w2s, w_root, shift)
    # TODO(synk): for v7x megacore, add a "parallel" edge-tile / node-row grid axis
    # with per-core partial aggregation scratch + core barrier; omitted here.


# ---------------------------------------------------------------------------
# Pure-JAX f32 reference (torch-faithful semantics, for correctness check)
# ---------------------------------------------------------------------------
def reference_forward(params, x, edge_index, edge_attr, batch, num_graphs,
                      num_layer, JK="last", graph_pooling="add"):
    n = x.shape[0]
    e = edge_attr.shape[0]
    c = params["lin_w"].shape[1]
    src, dst = edge_index[0], edge_index[1]

    h = _leaky_relu(x @ params["lin_w"] + params["lin_b"])
    x_list = [h]
    for layer in range(num_layer):
        lp = params["layers"][layer]
        hh = jnp.maximum(edge_attr @ lp["w1"] + lp["b1"], 0.0)
        w_e = (hh @ lp["w2"] + lp["b2"]).reshape(e, c, c)
        x_src = x_list[layer][src]
        msg = jnp.einsum("ei,eio->eo", x_src, w_e)
        aggr = jnp.zeros((n, c), jnp.float32).at[dst].add(msg)
        if graph_pooling == "mean":
            deg = jnp.zeros((n, 1), jnp.float32).at[dst].add(1.0)
            aggr = aggr / jnp.maximum(deg, 1.0)
        out = aggr + x_list[layer] @ lp["w_root"] + lp["b_conv"]
        out = out * lp["bn_scale"] + lp["bn_shift"]
        if layer != num_layer - 1:
            out = _leaky_relu(out)
        x_list.append(out)

    if JK == "last":
        h = x_list[-1]
    elif JK == "sum":
        h = sum(x_list[:num_layer])
    elif JK == "mean":
        h = sum(x_list[:num_layer]) / num_layer

    pooled = jnp.zeros((num_graphs, c), jnp.float32).at[batch].add(h)
    return pooled @ params["pred_w"] + params["pred_b"]


if __name__ == "__main__":
    NUM_LAYER = 2
    CONV_DIM = 32        # conv_dim
    NODE_DIM = 16        # n_atom_features()
    EDGE_DIM = 8         # n_bond_features()
    N, E, G = 24, 48, 2  # nodes, edges, graphs in the batch
    JK = "last"
    GRAPH_POOLING = "add"

    key = jax.random.PRNGKey(0)
    k = jax.random.split(key, 5)
    x = jax.random.normal(k[0], (N, NODE_DIM), jnp.float32)
    src = jax.random.randint(k[1], (E,), 0, N, dtype=jnp.int32)
    dst = jax.random.randint(k[2], (E,), 0, N, dtype=jnp.int32)
    edge_index = jnp.stack([src, dst])
    edge_attr = jax.random.normal(k[3], (E, EDGE_DIM), jnp.float32)
    batch = jnp.concatenate([jnp.zeros(N // 2, jnp.int32),
                             jnp.ones(N - N // 2, jnp.int32)])

    params = init_params(k[4], NUM_LAYER, NODE_DIM, EDGE_DIM, CONV_DIM)

    out = gnn_forward(params, x, edge_index, edge_attr, batch, G,
                      NUM_LAYER, JK=JK, graph_pooling=GRAPH_POOLING)
    out = jax.block_until_ready(out)

    ref = reference_forward(params, x, edge_index, edge_attr, batch, G,
                            NUM_LAYER, JK=JK, graph_pooling=GRAPH_POOLING)
    assert out.shape == (G, 1)
    # bf16 matmul operands (with f32 MXU accumulation) perturb results at the
    # ~1e-2 relative level vs. the pure-f32 reference; compare with matching slack.
    assert np.allclose(np.asarray(out), np.asarray(ref), rtol=5e-2, atol=2.5e-1), \
        (np.asarray(out), np.asarray(ref))

    print("KERNEL_OK")
</pallas_src>

<mosaic_0001>
module attributes {stable_mosaic.version = 11 : i64} {
  func.func @gnn_fused_kernel(%arg0: i32, %arg1: memref<24x16xf32, #tpu.memory_space<vmem>>, %arg2: memref<16x32xf32, #tpu.memory_space<vmem>>, %arg3: memref<1x32xf32, #tpu.memory_space<vmem>>, %arg4: memref<48x8xbf16, #tpu.memory_space<vmem>>, %arg5: memref<48x24xbf16, #tpu.memory_space<any>>, %arg6: memref<24x48xbf16, #tpu.memory_space<any>>, %arg7: memref<24x1xf32, #tpu.memory_space<vmem>>, %arg8: memref<8x256xbf16, #tpu.memory_space<vmem>>, %arg9: memref<256x32xbf16, #tpu.memory_space<vmem>>, %arg10: memref<2x24xbf16, #tpu.memory_space<vmem>>, %arg11: memref<32x1xf32, #tpu.memory_space<vmem>>, %arg12: memref<1x1xf32, #tpu.memory_space<vmem>>, %arg13: memref<1x8x8xbf16, #tpu.memory_space<vmem>>, %arg14: memref<1x1x8xf32, #tpu.memory_space<vmem>>, %arg15: memref<1x32x256xbf16, #tpu.memory_space<vmem>>, %arg16: memref<1x32x32xbf16, #tpu.memory_space<vmem>>, %arg17: memref<1x1x32xf32, #tpu.memory_space<vmem>>, %arg18: memref<2x1xf32, #tpu.memory_space<vmem>>, %arg19: memref<24x32xf32, #tpu.memory_space<vmem>>, %arg20: memref<48x24xbf16, #tpu.memory_space<vmem>>, %arg21: memref<24x48xbf16, #tpu.memory_space<vmem>>, %arg22: memref<2x!tpu.dma_semaphore, #tpu.memory_space<semaphore_mem>>) attributes {dimension_semantics = [#tpu.dimension_semantics<arbitrary>], iteration_bounds = array<i64: 2>, scalar_prefetch = 0 : i64, scratch_operands = 4 : i64, tpu.core_type = #tpu.core_type<tc>, window_params = [{pipeline_mode = #tpu.pipeline_mode<synchronous>, transform_indices = @transform_0, window_bounds = array<i64: 24, 16>}, {pipeline_mode = #tpu.pipeline_mode<synchronous>, transform_indices = @transform_1, window_bounds = array<i64: 16, 32>}, {pipeline_mode = #tpu.pipeline_mode<synchronous>, transform_indices = @transform_2, window_bounds = array<i64: 1, 32>}, {pipeline_mode = #tpu.pipeline_mode<synchronous>, transform_indices = @transform_3, window_bounds = array<i64: 48, 8>}, {}, {}, {pipeline_mode = #tpu.pipeline_mode<synchronous>, transform_indices = @transform_6, window_bounds = array<i64: 24, 1>}, {pipeline_mode = #tpu.pipeline_mode<synchronous>, transform_indices = @transform_7, window_bounds = array<i64: 8, 256>}, {pipeline_mode = #tpu.pipeline_mode<synchronous>, transform_indices = @transform_8, window_bounds = array<i64: 256, 32>}, {pipeline_mode = #tpu.pipeline_mode<synchronous>, transform_indices = @transform_9, window_bounds = array<i64: 2, 24>}, {pipeline_mode = #tpu.pipeline_mode<synchronous>, transform_indices = @transform_10, window_bounds = array<i64: 32, 1>}, {pipeline_mode = #tpu.pipeline_mode<synchronous>, transform_indices = @transform_11, window_bounds = array<i64: 1, 1>}, {transform_indices = @transform_12, window_bounds = array<i64: 1, 8, 8>}, {transform_indices = @transform_13, window_bounds = array<i64: 1, 1, 8>}, {transform_indices = @transform_14, window_bounds = array<i64: 1, 32, 256>}, {transform_indices = @transform_15, window_bounds = array<i64: 1, 32, 32>}, {transform_indices = @transform_16, window_bounds = array<i64: 1, 1, 32>}, {pipeline_mode = #tpu.pipeline_mode<synchronous>, transform_indices = @transform_17, window_bounds = array<i64: 2, 1>}]} {
    %c0_i32 = arith.constant 0 : i32
    %0 = arith.cmpi eq, %arg0, %c0_i32 : i32
    %1 = arith.extui %0 : i1 to i32
    %c0_i32_0 = arith.constant 0 : i32
    %2 = arith.cmpi ne, %1, %c0_i32_0 : i32
    scf.if %2 {
      %c0_i32_37 = arith.constant 0 : i32
      %45 = tpu.memref_slice %arg22[%c0_i32_37] : memref<2x!tpu.dma_semaphore, #tpu.memory_space<semaphore_mem>> -> memref<1x!tpu.dma_semaphore, #tpu.memory_space<semaphore_mem>>
      %46 = tpu.memref_squeeze %45 : memref<1x!tpu.dma_semaphore, #tpu.memory_space<semaphore_mem>> -> memref<!tpu.dma_semaphore, #tpu.memory_space<semaphore_mem>>
      tpu.enqueue_dma source(%arg5 : memref<48x24xbf16, #tpu.memory_space<any>>) target(%arg20 : memref<48x24xbf16, #tpu.memory_space<vmem>>) target_semaphore(%46 : memref<!tpu.dma_semaphore, #tpu.memory_space<semaphore_mem>>)
      %c1_i32_38 = arith.constant 1 : i32
      %47 = tpu.memref_slice %arg22[%c1_i32_38] : memref<2x!tpu.dma_semaphore, #tpu.memory_space<semaphore_mem>> -> memref<1x!tpu.dma_semaphore, #tpu.memory_space<semaphore_mem>>
      %48 = tpu.memref_squeeze %47 : memref<1x!tpu.dma_semaphore, #tpu.memory_space<semaphore_mem>> -> memref<!tpu.dma_semaphore, #tpu.memory_space<semaphore_mem>>
      tpu.enqueue_dma source(%arg6 : memref<24x48xbf16, #tpu.memory_space<any>>) target(%arg21 : memref<24x48xbf16, #tpu.memory_space<vmem>>) target_semaphore(%48 : memref<!tpu.dma_semaphore, #tpu.memory_space<semaphore_mem>>)
      %c0_i32_39 = arith.constant 0 : i32
      %49 = tpu.memref_slice %arg22[%c0_i32_39] : memref<2x!tpu.dma_semaphore, #tpu.memory_space<semaphore_mem>> -> memref<1x!tpu.dma_semaphore, #tpu.memory_space<semaphore_mem>>
      %50 = tpu.memref_squeeze %49 : memref<1x!tpu.dma_semaphore, #tpu.memory_space<semaphore_mem>> -> memref<!tpu.dma_semaphore, #tpu.memory_space<semaphore_mem>>
      tpu.wait_dma2 semaphore(%50 : memref<!tpu.dma_semaphore, #tpu.memory_space<semaphore_mem>>) src(%arg5 : memref<48x24xbf16, #tpu.memory_space<any>>) dst(%arg20 : memref<48x24xbf16, #tpu.memory_space<vmem>>)
      %c1_i32_40 = arith.constant 1 : i32
      %51 = tpu.memref_slice %arg22[%c1_i32_40] : memref<2x!tpu.dma_semaphore, #tpu.memory_space<semaphore_mem>> -> memref<1x!tpu.dma_semaphore, #tpu.memory_space<semaphore_mem>>
      %52 = tpu.memref_squeeze %51 : memref<1x!tpu.dma_semaphore, #tpu.memory_space<semaphore_mem>> -> memref<!tpu.dma_semaphore, #tpu.memory_space<semaphore_mem>>
      tpu.wait_dma2 semaphore(%52 : memref<!tpu.dma_semaphore, #tpu.memory_space<semaphore_mem>>) src(%arg6 : memref<24x48xbf16, #tpu.memory_space<any>>) dst(%arg21 : memref<24x48xbf16, #tpu.memory_space<vmem>>)
      %c0_41 = arith.constant 0 : index
      %c0_42 = arith.constant 0 : index
      %53 = vector.load %arg1[%c0_41, %c0_42] : memref<24x16xf32, #tpu.memory_space<vmem>>, vector<24x16xf32>
      %c0_43 = arith.constant 0 : index
      %c0_44 = arith.constant 0 : index
      %54 = vector.load %arg2[%c0_43, %c0_44] : memref<16x32xf32, #tpu.memory_space<vmem>>, vector<16x32xf32>
      %cst_45 = arith.constant dense<0.000000e+00> : vector<24x32xf32>
      %55 = tpu.matmul %53, %54, %cst_45 {dimension_numbers = #tpu.dot_dimension_numbers<[1], [0], [0], [1], [0, 0, 1, 1], [], []>} : vector<24x16xf32>, vector<16x32xf32>, vector<24x32xf32> -> vector<24x32xf32>
      %c0_46 = arith.constant 0 : index
      %c0_47 = arith.constant 0 : index
      %56 = vector.load %arg3[%c0_46, %c0_47] : memref<1x32xf32, #tpu.memory_space<vmem>>, vector<1x32xf32>
      %57 = vector.broadcast %56 : vector<1x32xf32> to vector<24x32xf32>
      %58 = arith.addf %55, %57 : vector<24x32xf32>
      %cst_48 = arith.constant 0.000000e+00 : f32
      %59 = vector.broadcast %cst_48 : f32 to vector<24x32xf32>
      %60 = arith.cmpf ogt, %58, %59 : vector<24x32xf32>
      %cst_49 = arith.constant 0.00999999977 : f32
      %61 = vector.broadcast %cst_49 : f32 to vector<24x32xf32>
      %62 = arith.mulf %61, %58 : vector<24x32xf32>
      %63 = arith.select %60, %58, %62 : vector<24x32xi1>, vector<24x32xf32>
      %c0_50 = arith.constant 0 : index
      %c0_51 = arith.constant 0 : index
      %64 = vector.load %arg19[%c0_50, %c0_51] : memref<24x32xf32, #tpu.memory_space<vmem>>, vector<24x32xf32>
      tpu.vector_store %arg19[%c0_50, %c0_51], %63 {strides = array<i32>} : memref<24x32xf32, #tpu.memory_space<vmem>>, vector<24x32xf32>,
    } else {
    }
    %c0 = arith.constant 0 : index
    %c0_1 = arith.constant 0 : index
    %3 = vector.load %arg19[%c0, %c0_1] : memref<24x32xf32, #tpu.memory_space<vmem>>, vector<24x32xf32>
    %4 = arith.truncf %3 : vector<24x32xf32> to vector<24x32xbf16>
    %c0_2 = arith.constant 0 : index
    %c0_3 = arith.constant 0 : index
    %5 = vector.load %arg4[%c0_2, %c0_3] : memref<48x8xbf16, #tpu.memory_space<vmem>>, vector<48x8xbf16>
    %c0_4 = arith.constant 0 : index
    %c0_5 = arith.constant 0 : index
    %c0_6 = arith.constant 0 : index
    %6 = vector.load %arg13[%c0_4, %c0_5, %c0_6] : memref<1x8x8xbf16, #tpu.memory_space<vmem>>, vector<1x8x8xbf16>
    %7 = vector.shape_cast %6 : vector<1x8x8xbf16> to vector<8x8xbf16>
    %cst = arith.constant dense<0.000000e+00> : vector<48x8xf32>
    %8 = tpu.matmul %5, %7, %cst {dimension_numbers = #tpu.dot_dimension_numbers<[1], [0], [0], [1], [0, 0, 1, 1], [], []>} : vector<48x8xbf16>, vector<8x8xbf16>, vector<48x8xf32> -> vector<48x8xf32>
    %c0_7 = arith.constant 0 : index
    %c0_8 = arith.constant 0 : index
    %c0_9 = arith.constant 0 : index
    %9 = vector.load %arg14[%c0_7, %c0_8, %c0_9] : memref<1x1x8xf32, #tpu.memory_space<vmem>>, vector<1x1x8xf32>
    %10 = vector.shape_cast %9 : vector<1x1x8xf32> to vector<1x8xf32>
    %11 = vector.broadcast %10 : vector<1x8xf32> to vector<48x8xf32>
    %12 = arith.addf %8, %11 : vector<48x8xf32>
    %cst_10 = arith.constant 0.000000e+00 : f32
    %13 = vector.broadcast %cst_10 : f32 to vector<48x8xf32>
    %14 = arith.maximumf %12, %13 : vector<48x8xf32>
    %c0_11 = arith.constant 0 : index
    %c0_12 = arith.constant 0 : index
    %15 = vector.load %arg20[%c0_11, %c0_12] : memref<48x24xbf16, #tpu.memory_space<vmem>>, vector<48x24xbf16>
    %cst_13 = arith.constant dense<0.000000e+00> : vector<48x32xf32>
    %16 = tpu.matmul %15, %4, %cst_13 {dimension_numbers = #tpu.dot_dimension_numbers<[1], [0], [0], [1], [0, 0, 1, 1], [], []>} : vector<48x24xbf16>, vector<24x32xbf16>, vector<48x32xf32> -> vector<48x32xf32>
    %17 = arith.truncf %16 : vector<48x32xf32> to vector<48x32xbf16>
    %c0_14 = arith.constant 0 : index
    %c0_15 = arith.constant 0 : index
    %c0_16 = arith.constant 0 : index
    %18 = vector.load %arg15[%c0_14, %c0_15, %c0_16] : memref<1x32x256xbf16, #tpu.memory_space<vmem>>, vector<1x32x256xbf16>
    %19 = vector.shape_cast %18 : vector<1x32x256xbf16> to vector<32x256xbf16>
    %cst_17 = arith.constant dense<0.000000e+00> : vector<48x256xf32>
    %20 = tpu.matmul %17, %19, %cst_17 {dimension_numbers = #tpu.dot_dimension_numbers<[1], [0], [0], [1], [0, 0, 1, 1], [], []>} : vector<48x32xbf16>, vector<32x256xbf16>, vector<48x256xf32> -> vector<48x256xf32>
    %21 = arith.truncf %14 : vector<48x8xf32> to vector<48x8xbf16>
    %c0_18 = arith.constant 0 : index
    %c0_19 = arith.constant 0 : index
    %22 = vector.load %arg8[%c0_18, %c0_19] : memref<8x256xbf16, #tpu.memory_space<vmem>>, vector<8x256xbf16>
    %cst_20 = arith.constant dense<0.000000e+00> : vector<48x256xf32>
    %23 = tpu.matmul %21, %22, %cst_20 {dimension_numbers = #tpu.dot_dimension_numbers<[1], [0], [0], [1], [0, 0, 1, 1], [], []>} : vector<48x8xbf16>, vector<8x256xbf16>, vector<48x256xf32> -> vector<48x256xf32>
    %24 = arith.mulf %23, %20 : vector<48x256xf32>
    %25 = arith.truncf %24 : vector<48x256xf32> to vector<48x256xbf16>
    %c0_21 = arith.constant 0 : index
    %c0_22 = arith.constant 0 : index
    %26 = vector.load %arg9[%c0_21, %c0_22] : memref<256x32xbf16, #tpu.memory_space<vmem>>, vector<256x32xbf16>
    %cst_23 = arith.constant dense<0.000000e+00> : vector<48x32xf32>
    %27 = tpu.matmul %25, %26, %cst_23 {dimension_numbers = #tpu.dot_dimension_numbers<[1], [0], [0], [1], [0, 0, 1, 1], [], []>} : vector<48x256xbf16>, vector<256x32xbf16>, vector<48x32xf32> -> vector<48x32xf32>
    %c0_24 = arith.constant 0 : index
    %c0_25 = arith.constant 0 : index
    %28 = vector.load %arg21[%c0_24, %c0_25] : memref<24x48xbf16, #tpu.memory_space<vmem>>, vector<24x48xbf16>
    %29 = arith.truncf %27 : vector<48x32xf32> to vector<48x32xbf16>
    %cst_26 = arith.constant dense<0.000000e+00> : vector<24x32xf32>
    %30 = tpu.matmul %28, %29, %cst_26 {dimension_numbers = #tpu.dot_dimension_numbers<[1], [0], [0], [1], [0, 0, 1, 1], [], []>} : vector<24x48xbf16>, vector<48x32xbf16>, vector<24x32xf32> -> vector<24x32xf32>
    %c0_27 = arith.constant 0 : index
    %c0_28 = arith.constant 0 : index
    %c0_29 = arith.constant 0 : index
    %31 = vector.load %arg16[%c0_27, %c0_28, %c0_29] : memref<1x32x32xbf16, #tpu.memory_space<vmem>>, vector<1x32x32xbf16>
    %32 = vector.shape_cast %31 : vector<1x32x32xbf16> to vector<32x32xbf16>
    %cst_30 = arith.constant dense<0.000000e+00> : vector<24x32xf32>
    %33 = tpu.matmul %4, %32, %cst_30 {dimension_numbers = #tpu.dot_dimension_numbers<[1], [0], [0], [1], [0, 0, 1, 1], [], []>} : vector<24x32xbf16>, vector<32x32xbf16>, vector<24x32xf32> -> vector<24x32xf32>
    %34 = arith.addf %30, %33 : vector<24x32xf32>
    %c0_31 = arith.constant 0 : index
    %c0_32 = arith.constant 0 : index
    %c0_33 = arith.constant 0 : index
    %35 = vector.load %arg17[%c0_31, %c0_32, %c0_33] : memref<1x1x32xf32, #tpu.memory_space<vmem>>, vector<1x1x32xf32>
    %36 = vector.shape_cast %35 : vector<1x1x32xf32> to vector<1x32xf32>
    %37 = vector.broadcast %36 : vector<1x32xf32> to vector<24x32xf32>
    %38 = arith.addf %34, %37 : vector<24x32xf32>
    %c1_i32 = arith.constant 1 : i32
    %39 = arith.cmpi ne, %arg0, %c1_i32 : i32
    %40 = arith.extui %39 : i1 to i32
    %c0_i32_34 = arith.constant 0 : i32
    %41 = arith.cmpi ne, %40, %c0_i32_34 : i32
    scf.if %41 {
      %cst_37 = arith.constant 0.000000e+00 : f32
      %45 = vector.broadcast %cst_37 : f32 to vector<24x32xf32>
      %46 = arith.cmpf ogt, %38, %45 : vector<24x32xf32>
      %cst_38 = arith.constant 0.00999999977 : f32
      %47 = vector.broadcast %cst_38 : f32 to vector<24x32xf32>
      %48 = arith.mulf %47, %38 : vector<24x32xf32>
      %49 = arith.select %46, %38, %48 : vector<24x32xi1>, vector<24x32xf32>
      %c0_39 = arith.constant 0 : index
      %c0_40 = arith.constant 0 : index
      %50 = vector.load %arg19[%c0_39, %c0_40] : memref<24x32xf32, #tpu.memory_space<vmem>>, vector<24x32xf32>
      tpu.vector_store %arg19[%c0_39, %c0_40], %49 {strides = array<i32>} : memref<24x32xf32, #tpu.memory_space<vmem>>, vector<24x32xf32>,
    } else {
    }
    %c1_i32_35 = arith.constant 1 : i32
    %42 = arith.cmpi eq, %arg0, %c1_i32_35 : i32
    %43 = arith.extui %42 : i1 to i32
    %c0_i32_36 = arith.constant 0 : i32
    %44 = arith.cmpi ne, %43, %c0_i32_36 : i32
    scf.if %44 {
      %c0_37 = arith.constant 0 : index
      %c0_38 = arith.constant 0 : index
      %45 = vector.load %arg10[%c0_37, %c0_38] : memref<2x24xbf16, #tpu.memory_space<vmem>>, vector<2x24xbf16>
      %46 = arith.truncf %38 : vector<24x32xf32> to vector<24x32xbf16>
      %cst_39 = arith.constant dense<0.000000e+00> : vector<2x32xf32>
      %47 = tpu.matmul %45, %46, %cst_39 {dimension_numbers = #tpu.dot_dimension_numbers<[1], [0], [0], [1], [0, 0, 1, 1], [], []>} : vector<2x24xbf16>, vector<24x32xbf16>, vector<2x32xf32> -> vector<2x32xf32>
      %c0_40 = arith.constant 0 : index
      %c0_41 = arith.constant 0 : index
      %48 = vector.load %arg11[%c0_40, %c0_41] : memref<32x1xf32, #tpu.memory_space<vmem>>, vector<32x1xf32>
      %cst_42 = arith.constant dense<0.000000e+00> : vector<2x1xf32>
      %49 = tpu.matmul %47, %48, %cst_42 {dimension_numbers = #tpu.dot_dimension_numbers<[1], [0], [0], [1], [0, 0, 1, 1], [], []>} : vector<2x32xf32>, vector<32x1xf32>, vector<2x1xf32> -> vector<2x1xf32>
      %c0_43 = arith.constant 0 : index
      %c0_44 = arith.constant 0 : index
      %50 = vector.load %arg12[%c0_43, %c0_44] : memref<1x1xf32, #tpu.memory_space<vmem>>, vector<1x1xf32>
      %51 = vector.broadcast %50 : vector<1x1xf32> to vector<2x1xf32>
      %52 = arith.addf %49, %51 : vector<2x1xf32>
      %c0_45 = arith.constant 0 : index
      %c0_46 = arith.constant 0 : index
      %53 = vector.load %arg18[%c0_45, %c0_46] : memref<2x1xf32, #tpu.memory_space<vmem>>, vector<2x1xf32>
      tpu.vector_store %arg18[%c0_45, %c0_46], %52 {strides = array<i32>} : memref<2x1xf32, #tpu.memory_space<vmem>>, vector<2x1xf32>,
    } else {
    }
    return
  }
  func.func @transform_0(%arg0: i32) -> (i32, i32) {
    %c0_i32 = arith.constant 0 : i32
    %c0_i32_0 = arith.constant 0 : i32
    %c0_i32_1 = arith.constant 0 : i32
    return %c0_i32, %c0_i32_0 : i32, i32
  }
  func.func @transform_1(%arg0: i32) -> (i32, i32) {
    %c0_i32 = arith.constant 0 : i32
    %c0_i32_0 = arith.constant 0 : i32
    %c0_i32_1 = arith.constant 0 : i32
    return %c0_i32, %c0_i32_0 : i32, i32
  }
  func.func @transform_2(%arg0: i32) -> (i32, i32) {
    %c0_i32 = arith.constant 0 : i32
    %c0_i32_0 = arith.constant 0 : i32
    %c0_i32_1 = arith.constant 0 : i32
    return %c0_i32, %c0_i32_0 : i32, i32
  }
  func.func @transform_3(%arg0: i32) -> (i32, i32) {
    %c0_i32 = arith.constant 0 : i32
    %c0_i32_0 = arith.constant 0 : i32
    %c0_i32_1 = arith.constant 0 : i32
    return %c0_i32, %c0_i32_0 : i32, i32
  }
  func.func @transform_6(%arg0: i32) -> (i32, i32) {
    %c0_i32 = arith.constant 0 : i32
    %c0_i32_0 = arith.constant 0 : i32
    %c0_i32_1 = arith.constant 0 : i32
    return %c0_i32, %c0_i32_0 : i32, i32
  }
  func.func @transform_7(%arg0: i32) -> (i32, i32) {
    %c0_i32 = arith.constant 0 : i32
    %c0_i32_0 = arith.constant 0 : i32
    %c0_i32_1 = arith.constant 0 : i32
    return %c0_i32, %c0_i32_0 : i32, i32
  }
  func.func @transform_8(%arg0: i32) -> (i32, i32) {
    %c0_i32 = arith.constant 0 : i32
    %c0_i32_0 = arith.constant 0 : i32
    %c0_i32_1 = arith.constant 0 : i32
    return %c0_i32, %c0_i32_0 : i32, i32
  }
  func.func @transform_9(%arg0: i32) -> (i32, i32) {
    %c0_i32 = arith.constant 0 : i32
    %c0_i32_0 = arith.constant 0 : i32
    %c0_i32_1 = arith.constant 0 : i32
    return %c0_i32, %c0_i32_0 : i32, i32
  }
  func.func @transform_10(%arg0: i32) -> (i32, i32) {
    %c0_i32 = arith.constant 0 : i32
    %c0_i32_0 = arith.constant 0 : i32
    %c0_i32_1 = arith.constant 0 : i32
    return %c0_i32, %c0_i32_0 : i32, i32
  }
  func.func @transform_11(%arg0: i32) -> (i32, i32) {
    %c0_i32 = arith.constant 0 : i32
    %c0_i32_0 = arith.constant 0 : i32
    %c0_i32_1 = arith.constant 0 : i32
    return %c0_i32, %c0_i32_0 : i32, i32
  }
  func.func @transform_12(%arg0: i32) -> (i32, i32, i32) {
    %c0_i32 = arith.constant 0 : i32
    %c0_i32_0 = arith.constant 0 : i32
    %c0_i32_1 = arith.constant 0 : i32
    return %arg0, %c0_i32, %c0_i32_0 : i32, i32, i32
  }
  func.func @transform_13(%arg0: i32) -> (i32, i32, i32) {
    %c0_i32 = arith.constant 0 : i32
    %c0_i32_0 = arith.constant 0 : i32
    %c0_i32_1 = arith.constant 0 : i32
    return %arg0, %c0_i32, %c0_i32_0 : i32, i32, i32
  }
  func.func @transform_14(%arg0: i32) -> (i32, i32, i32) {
    %c0_i32 = arith.constant 0 : i32
    %c0_i32_0 = arith.constant 0 : i32
    %c0_i32_1 = arith.constant 0 : i32
    return %arg0, %c0_i32, %c0_i32_0 : i32, i32, i32
  }
  func.func @transform_15(%arg0: i32) -> (i32, i32, i32) {
    %c0_i32 = arith.constant 0 : i32
    %c0_i32_0 = arith.constant 0 : i32
    %c0_i32_1 = arith.constant 0 : i32
    return %arg0, %c0_i32, %c0_i32_0 : i32, i32, i32
  }
  func.func @transform_16(%arg0: i32) -> (i32, i32, i32) {
    %c0_i32 = arith.constant 0 : i32
    %c0_i32_0 = arith.constant 0 : i32
    %c0_i32_1 = arith.constant 0 : i32
    return %arg0, %c0_i32, %c0_i32_0 : i32, i32, i32
  }
  func.func @transform_17(%arg0: i32) -> (i32, i32) {
    %c0_i32 = arith.constant 0 : i32
    %c0_i32_0 = arith.constant 0 : i32
    %c0_i32_1 = arith.constant 0 : i32
    return %c0_i32, %c0_i32_0 : i32, i32
  }
}

</mosaic_0001>

<bundles_post_ra>
// kernel: tpu_custom_call.1
= control target key start
LH: loop header
LB: loop body
LE: loop exit
PB: predicated region body
PF: predicated region fallthrough
CT: control target
= control target key end

     0   :  { %s1728_s25 = smov 0   ;;  %s1945_s0 = inlined_call_operand.vmem [shape: f32[24,16], index: 0, kind: input, shape index: {}]   ;;  %s1946_s1 = inlined_call_operand.vmem [shape: f32[16,32], index: 1, kind: input, shape index: {}]   ;;  %s1947_s2 = inlined_call_operand.vmem [shape: f32[1,32], index: 2, kind: input, shape index: {}]   ;;  %s1948_s3 = inlined_call_operand.vmem [shape: bf16[48,8], index: 3, kind: input, shape index: {}]   ;;  %s1949_s4 = inlined_call_operand.vmem [shape: bf16[48,24], index: 4, kind: input, shape index: {}]   ;;  %s1950_s5 = inlined_call_operand.vmem [shape: bf16[24,48], index: 5, kind: input, shape index: {}]   ;;  %s1951_s6 = inlined_call_operand.vmem [shape: f32[24,1], index: 6, kind: input, shape index: {}]   ;;  %s1952_s7 = inlined_call_operand.vmem [shape: bf16[8,256], index: 7, kind: input, shape index: {}]   ;;  %s1953_s8 = inlined_call_operand.vmem [shape: bf16[256,32], index: 8, kind: input, shape index: {}]   ;;  %s1954_s9 = inlined_call_operand.vmem [shape: bf16[2,24], index: 9, kind: input, shape index: {}]   ;;  %s1955_s10 = inlined_call_operand.vmem [shape: f32[32,1], index: 10, kind: input, shape index: {}]   ;;  %s1956_s11 = inlined_call_operand.<no memory space> [shape: f32[1,1], index: 11, kind: input, shape index: {}]   ;;  %s1957_s12 = inlined_call_operand.vmem [shape: bf16[2,8,8], index: 12, kind: input, shape index: {}]   ;;  %s1958_s13 = inlined_call_operand.vmem [shape: f32[2,1,8], index: 13, kind: input, shape index: {}]   ;;  %s1959_s14 = inlined_call_operand.vmem [shape: bf16[2,32,256], index: 14, kind: input, shape index: {}]   ;;  %s1960_s15 = inlined_call_operand.vmem [shape: bf16[2,32,32], index: 15, kind: input, shape index: {}]   ;;  %s1961_s16 = inlined_call_operand.vmem [shape: f32[2,1,32], index: 16, kind: input, shape index: {}]   ;;  %s1962_s17 = inlined_call_operand.vmem [shape: f32[2,1], index: 17, kind: output, shape index: {}]  }
   0x1   :  { %1966 = sst [smem:[#allocation12_spill]] %s1945_s0  ;;  %v22_v0 = vstv %s1956_s11 }
   0x2   :  { %1967 = sst [smem:[#allocation13_spill]] %s1946_s1  ;;  %23 = vst [vmem:[#allocation6] sm:$0x1] %v22_v0 }
   0x3   :  { %1968 = sst [smem:[#allocation14_spill]] %s1962_s17 }
   0x4 LB: > { %1969 = sst [smem:[#allocation11_spill]] %s1633_s25  ;;  %s1734_s26 = sadd.s32 4294967295, %s1633_s25   ;;  %s1633_s25 = sphi %s1728_s25, %s29_s25  }
   0x5   : > { %p1415_p0 = scmp.ge.s32.totalorder %s1633_s25, 1  ;;  %p471_p1 = scmp.lt.s32.totalorder %s1633_s25, 3 }
   0x7   : > { %p472_p2 = pnand %p1415_p0, %p471_p1 }
   0x8   : > { %p529_p3 = scmp.lt.s32.totalorder (!%p472_p2), %s1734_s26, 1  ;;  %p1421_p4 = scmp.ne.s32.totalorder (!%p472_p2), %s1734_s26, 0 }
   0x9   : > { %475 = sbr.rel (%p472_p2) target bundleno = 1091 (0x443), region = 80 }
   0xe   : > { %s1740_s11 = scalar_select %p529_p3, %s1734_s26, 1 }
   0xf   : > { %553 = sbr.rel (%p1421_p4) target bundleno = 179 (0xb3), region = 84 }
  0x10   : > { %s1416_s27 = sshll.u32 %s1740_s11, 2  ;;  %s535_s0 = scalar_lea.vmem %s1958_s13, %s1740_s11 }
  0x11   : > { %s1750_s18 = scalar_lea.vmem %s1957_s12, %s1416_s27  ;;  %s1572_s1 = sshll.u32 %s1740_s11, 5 }
  0x12   : > { %s1756_s21 = scalar_lea.vmem %s1959_s14, %s1572_s1  ;;  %s1573_s22 = sshll.u32 %s1740_s11, 4 }
  0x13   : > { %s1762_s25 = scalar_lea.vmem %s1960_s15, %s1573_s22 }
  0x14   : > { %v564_v1 = vld [vmem:[%s1949_s4] sm:$0xff]  ;;  %v566_v2 = vld [vmem:[%s1949_s4 + $0x8] sm:$0xff]  ;;  %v568_v3 = vld [vmem:[%s1949_s4 + $0x10] sm:$0xff] }
  0x15   : > { %565 = vst [vmem:[#allocation3 + $0x10] sm:$0xff] %v564_v1 }
  0x16   : > { %567 = vst [vmem:[#allocation3] sm:$0xff] %v566_v2 }
  0x17   : > { %569 = vst [vmem:[#allocation3 + $0x8] sm:$0xff] %v568_v3 }
  0x18   : > { %575 = vsyncadd [#allocation5], 384  ;;  %v589_v4 = vld [vmem:[%s1950_s5] sm:$0xff]  ;;  %v1422_v5 = vld [vmem:[%s1950_s5 + $0x8] sm:$0xf] }
  0x19   : > { %590 = vst [vmem:[#allocation4] sm:$0xff] %v589_v4 }
  0x1a   : > { %602 = vst [vmem:[#allocation4 + $0x8] sm:$0xf] %v1422_v5 }
  0x1b   : > { %606 = vsyncadd [#allocation5 + $0x1], 192 }
  0x1c   : > { %1627 = dma.done.wait [#allocation5], 384 }
  0x1d   : > { %1628 = vsyncadd [#allocation5], 4294966912 }
  0x1e   : > { %1629 = dma.done.wait [#allocation5 + $0x1], 192 }
  0x1f   : > { %1630 = vsyncadd [#allocation5 + $0x1], 4294967104  ;;  %s1970_s6 = sld [smem:[#allocation13_spill]]  ;;  %vm624_vm0 = vcmask 130048   ;;  %v1619_v11 = vld [vmem:[%s1947_s2] ss:$0 sm:$0xff] }
  0x20   : > { %s1971_s17 = sld [smem:[#allocation12_spill]]  ;;  %vm669_vm1 = vcmask 261120  }
  0x25   : > { %v619_v6 = vld [vmem:[%s1970_s6 + $0x8] sm:$0xff]  ;;  %v618_v7 = vld [vmem:[%s1970_s6] sm:$0xff] }
  0x26   : > { %1604 = vmatpush.msra.mxu2 %v619_v6  ;;  %v617_v8 = vld [vmem:[%s1971_s17 + $0x10] sm:$0xff]  ;;  %648 = vmatpush.msra.mxu0 %v619_v6  ;;  %v615_v9 = vld [vmem:[%s1971_s17] sm:$0xff]  ;;  %v616_v10 = vld [vmem:[%s1971_s17 + $0x8] sm:$0xff] }
  0x27   : > { %1603 = vmatpush.msra.mxu1 %v619_v6 }
  0x28   : > { %1606 = vmatpush.msra.mxu2 %v618_v7  ;;  %649 = vmatpush.msra.mxu0 %v618_v7 }
  0x29   : > { %1425 = vmatmul.msk.f32.vlgmr.msra.gmra.mxu2 %vm624_vm0, %v617_v8  ;;  %1605 = vmatpush.msra.mxu1 %v618_v7 }
  0x2a   : > { %1423 = vmatmul.msk.f32.vlgmr.msra.gmra.mxu0 %vm624_vm0, %v615_v9  ;;  %1424 = vmatmul.msk.f32.vlgmr.msra.gmra.mxu1 %vm624_vm0, %v616_v10 }
  0xa7   : > { %v651_v12 = vpop.f32.mrf.mxu0  ;;  %v654_v13 = vpop.f32.mrf.mxu1 }
  0xa8   : > { %v652_v14 = vadd.f32 %v1619_v11, %v651_v12  ;;  %v655_v15 = vadd.f32 %v1619_v11, %v654_v13 }
  0xaa   : > { %vm660_vm2 = vcmp.gt.f32.partialorder %v652_v14, 0.0  ;;  %v663_v16 = vmul.f32 0.01, %v652_v14  ;;  %vm661_vm3 = vcmp.gt.f32.partialorder %v655_v15, 0.0  ;;  %v664_v17 = vmul.f32 0.01, %v655_v15 }
  0xac   : > { %v666_v18 = vsel %vm660_vm2, %v652_v14, %v663_v16  ;;  %v667_v19 = vsel %vm661_vm3, %v655_v15, %v664_v17  ;;  %v657_v20 = vpop.f32.mrf.mxu2 }
  0xad   : > { %670 = vst.msk [vmem:[#allocation2] sm:$0xff] %vm669_vm1, %v666_v18  ;;  %v658_v21 = vadd.f32 %v1619_v11, %v657_v20 }
  0xae   : > { %671 = vst.msk [vmem:[#allocation2 + $0x8] sm:$0xff] %vm669_vm1, %v667_v19 }
  0xaf   : > { %vm662_vm4 = vcmp.gt.f32.partialorder %v658_v21, 0.0  ;;  %v665_v22 = vmul.f32 0.01, %v658_v21 }
  0xb1   : > { %v668_v23 = vsel %vm662_vm4, %v658_v21, %v665_v22 }
  0xb2   : > { %672 = vst.msk [vmem:[#allocation2 + $0x10] sm:$0xff] %vm669_vm1, %v668_v23 }
  0xb3 PF: > { %v684_v24 = vld [vmem:[%s1750_s18] sm:$0xf]  ;;  %vm714_vm5 = vcmask 1043456   ;;  %vm704_vm6 = vcmask 64512   ;;  %v1577_v33 = vld [vmem:[#allocation3 + $0x10] sm:$0xff]  ;;  %vm769_vm7 = vcmask 195584   ;;  %s1972_s19 = scalar_lea.vmem %s1961_s16, %s1740_s11 }
  0xb4   : > { %v716_v26 = vsel %vm714_vm5, %v684_v24, 0  ;;  %v1574_v28 = vld [vmem:[%s1948_s3] sm:$0xff]  ;;  %v1575_v35 = vld [vmem:[%s1948_s3 + $0x8] sm:$0xff]  ;;  %v1578_v36 = vld [vmem:[#allocation3] sm:$0xff]  ;;  %vm833_vm8 = vcmask 261120   ;;  %vm1210_vm9 = vcmask 392192  }
  0xb5   : > { %v673_v29 = vld [vmem:[#allocation2] sm:$0xff]  ;;  %v674_v30 = vld [vmem:[#allocation2 + $0x8] sm:$0xff]  ;;  %725 = vmatpush.bf16.msra.mxu0 %v716_v26  ;;  %v1576_v37 = vld [vmem:[%s1948_s3 + $0x10] sm:$0xff]  ;;  %p1564_p5 = scmp.eq.s32.totalorder %s1734_s26, 1 }
  0xb6   : > { %v1811_v32 = vpack.c.bf16 %v674_v30, %v673_v29  ;;  %v1579_v34 = vld [vmem:[#allocation3 + $0x8] sm:$0xff]  ;;  %v1466_v39 = vld [vmem:[%s1756_s21 + $0x10] sm:$0xf]  ;;  %v1583_v40 = vld [vmem:[%s1756_s21 + $0x14] sm:$0xf0] }
  0xb7   : > { %v894_v38 = vld [vmem:[%s1952_s7] sm:$0xff]  ;;  %v1582_v41 = vld [vmem:[%s1756_s21 + $0x14] sm:$0xf]  ;;  %v1467_v44 = vor.u32 %v1583_v40, %v1466_v39  ;;  %v1468_v45 = vld [vmem:[%s1756_s21 + $0x18] sm:$0xf0] }
  0xb8   : > { %1438 = vmatmul.msk.bf16.vlgmr.msra.gmra.mxu0 %vm704_vm6, %v1574_v28  ;;  %v896_v42 = vunpack.c.l.b16 %v894_v38  ;;  %v897_v43 = vunpack.c.h.b16 %v894_v38  ;;  %v1471_v46 = vor.u32 %v1582_v41, %v1468_v45  ;;  %v1458_v51 = vld [vmem:[%s1756_s21] sm:$0xf]  ;;  %v1581_v52 = vld [vmem:[%s1756_s21 + $0x4] sm:$0xf0]  ;;  %v1580_v54 = vld [vmem:[%s1756_s21 + $0x4] sm:$0xf] }
  0xb9   : > { %v675_v25 = vld [vmem:[#allocation2 + $0x10] sm:$0xff]  ;;  %v1459_v53 = vor.u32 %v1581_v52, %v1458_v51  ;;  %v1460_v55 = vld [vmem:[%s1756_s21 + $0x8] sm:$0xf0]  ;;  %v1620_v58 = vld [vmem:[%s535_s0] ss:$0 sm:$0xff] }
  0xba   : > { %v1804_v27 = vpack.c.bf16 %v675_v25, %v675_v25  ;;  %v898_v47 = vpack.c.b16 %v896_v42, %v896_v42  ;;  %v899_v48 = vpack.c.b16 %v897_v43, %v897_v43  ;;  %873 = vmatpush.bf16.msra.mxu3 %v1471_v46  ;;  %v1463_v56 = vor.u32 %v1580_v54, %v1460_v55  ;;  %v1591_v5 = vld [vmem:[%s1953_s8 + $0x38] sm:$0xff]  ;;  %v1590_v7 = vld [vmem:[%s1953_s8 + $0x30] sm:$0xff]  ;;  %v1589_v11 = vld [vmem:[%s1953_s8 + $0x28] sm:$0xff] }
  0xbb   : > { %v1599_v6 = vld [vmem:[%s1953_s8 + $0x78] sm:$0xff]  ;;  %v1598_v8 = vld [vmem:[%s1953_s8 + $0x70] sm:$0xff]  ;;  %v1597_v12 = vld [vmem:[%s1953_s8 + $0x68] sm:$0xff] }
  0xbc   : > { %v780_v31 = vsel %vm714_vm5, %v1804_v27, 0  ;;  %v910_v49 = vsel %vm714_vm5, %v898_v47, 0  ;;  %v913_v50 = vsel %vm714_vm5, %v899_v48, 0  ;;  %v1585_v38 = vld [vmem:[%s1953_s8 + $0x8] sm:$0xff]  ;;  %v1584_v40 = vld [vmem:[%s1953_s8] sm:$0xff] }
  0xbd   : > { %788 = vmatpush.bf16.msra.mxu1 %v780_v31  ;;  %1607 = vmatpush.bf16.msra.mxu2 %v780_v31  ;;  %v1588_v31 = vld [vmem:[%s1953_s8 + $0x20] sm:$0xff]  ;;  %v1593_v39 = vld [vmem:[%s1953_s8 + $0x48] sm:$0xff] }
  0xbe   : > { %922 = vmatpush.bf16.msrb.mxu0 %v910_v49  ;;  %874 = vmatpush.bf16.msra.mxu3 %v1463_v56  ;;  %v1592_v41 = vld [vmem:[%s1953_s8 + $0x40] sm:$0xff] }
  0xc1   : > { %789 = vmatpush.bf16.msra.mxu1 %v1811_v32  ;;  %1608 = vmatpush.bf16.msra.mxu2 %v1811_v32 }
  0xc2   : > { %1133 = vmatpush.bf16.msrb.mxu3 %v1599_v6 }
  0xc4   : > { %1453 = vmatmul.msk.bf16.vlgmr.msra.gmra.mxu1 %vm769_vm7, %v1577_v33  ;;  %1455 = vmatmul.msk.bf16.vlgmr.msra.gmra.mxu2 %vm769_vm7, %v1579_v34  ;;  %v1596_v33 = vld [vmem:[%s1953_s8 + $0x60] sm:$0xff]  ;;  %v1587_v34 = vld [vmem:[%s1953_s8 + $0x18] sm:$0xff] }
  0xc5   : > { %849 = vmatpush.bf16.msrb.mxu2 %v1467_v44  ;;  %946 = vmatpush.bf16.msrb.mxu1 %v913_v50 }
  0xc6   : > { %1134 = vmatpush.bf16.msrb.mxu3 %v1598_v8 }
  0xc8   : > { %1439 = vmatmul.msk.bf16.gmra.mxu0 %vm704_vm6, %v1575_v35  ;;  %v1595_v35 = vld [vmem:[%s1953_s8 + $0x58] sm:$0xff] }
  0xc9   : > { %850 = vmatpush.bf16.msrb.mxu2 %v1459_v53 }
  0xca   : > { %1135 = vmatpush.bf16.msrb.mxu3 %v1597_v12 }
  0xcd   : > { %1109 = vmatpush.bf16.msra.mxu2 %v1591_v5 }
  0xce   : > { %1136 = vmatpush.bf16.msrb.mxu3 %v1596_v33 }
  0xd1   : > { %1110 = vmatpush.bf16.msra.mxu2 %v1590_v7 }
  0xd2   : > { %1137 = vmatpush.bf16.msrb.mxu3 %v1595_v35 }
  0xd4   : > { %1454 = vmatmul.msk.bf16.gmra.mxu1 %vm769_vm7, %v1578_v36  ;;  %v1586_v36 = vld [vmem:[%s1953_s8 + $0x10] sm:$0xff] }
  0xd5   : > { %1111 = vmatpush.bf16.msra.mxu2 %v1589_v11 }
  0xd8   : > { %1440 = vmatmul.msk.bf16.gmra.mxu0 %vm704_vm6, %v1576_v37  ;;  %v1594_v37 = vld [vmem:[%s1953_s8 + $0x50] sm:$0xff] }
  0xd9   : > { %1112 = vmatpush.bf16.msra.mxu2 %v1588_v31  ;;  %1138 = vmatpush.bf16.msrb.mxu3 %v1594_v37 }
  0xdd   : > { %1113 = vmatpush.bf16.msra.mxu2 %v1587_v34  ;;  %1139 = vmatpush.bf16.msrb.mxu3 %v1593_v39 }
  0xe1   : > { %1114 = vmatpush.bf16.msra.mxu2 %v1586_v36  ;;  %1140 = vmatpush.bf16.msrb.mxu3 %v1592_v41 }
  0xe5   : > { %1115 = vmatpush.bf16.msra.mxu2 %v1585_v38 }
  0xe9   : > { %1116 = vmatpush.bf16.msra.mxu2 %v1584_v40 }
 0x135   : > { %v727_v57 = vpop.f32.mrf.mxu0 }
 0x136   : > { %v728_v59 = vadd.f32 %v1620_v58, %v727_v57 }
 0x138   : > { %v742_v62 = vmax.f32 %v728_v59, 0.0 }
 0x13d   : > { %v729_v61 = vpop.f32.mrf.mxu0 }
 0x13e   : > { %v730_v63 = vadd.f32 %v1620_v58, %v729_v61 }
 0x140   : > { %v743_v0 = vmax.f32 %v730_v63, 0.0 }
 0x141   : > { %v791_v60 = vpop.f32.mrf.mxu1 }
 0x142   : > { %v891_v1 = vpack.c.bf16 %v743_v0, %v742_v62 }
 0x144   : > { %1478 = vmatmul.msk.bf16.vlgmr.msrb.gmra.mxu0 %vm704_vm6, %v891_v1  ;;  %1481 = vmatmul.msk.bf16.vlgmr.msrb.gmra.mxu1 %vm704_vm6, %v891_v1 }
 0x145   : > { %v732_v4 = vpop.f32.mrf.mxu0 }
 0x146   : > { %v733_v9 = vadd.f32 %v1620_v58, %v732_v4 }
 0x147   : > { %v801_v21 = vpop.f32.mrf.mxu2 }
 0x148   : > { %v744_v14 = vmax.f32 %v733_v9, 0.0 }
 0x149   : > { %v793_v2 = vpop.f32.mrf.mxu1 }
 0x14a   : > { %v806_v3 = vpack.c.bf16 %v793_v2, %v791_v60 }
 0x14c   : > { %1472 = vmatmul.msk.bf16.vlgmr.msrb.gmra.mxu2 %vm833_vm8, %v806_v3  ;;  %1475 = vmatmul.msk.bf16.vlgmr.msra.gmra.mxu3 %vm833_vm8, %v806_v3 }
 0x14d   : > { %v734_v13 = vpop.f32.mrf.mxu0 }
 0x14e   : > { %v735_v15 = vadd.f32 %v1620_v58, %v734_v13 }
 0x14f   : > { %v803_v28 = vpop.f32.mrf.mxu2 }
 0x150   : > { %v745_v16 = vmax.f32 %v735_v15, 0.0  ;;  %v808_v30 = vpack.c.bf16 %v803_v28, %v801_v21  ;;  %v1601_v28 = vld [vmem:[%s1762_s25] sm:$0xff] }
 0x151   : > { %v796_v10 = vpop.f32.mrf.mxu1 }
 0x152   : > { %v892_v17 = vpack.c.bf16 %v745_v16, %v744_v14 }
 0x154   : > { %1479 = vmatmul.msk.bf16.gmra.mxu0 %vm704_vm6, %v892_v17  ;;  %1482 = vmatmul.msk.bf16.gmra.mxu1 %vm704_vm6, %v892_v17 }
 0x155   : > { %v737_v20 = vpop.f32.mrf.mxu0 }
 0x156   : > { %v738_v22 = vadd.f32 %v1620_v58, %v737_v20 }
 0x158   : > { %v746_v24 = vmax.f32 %v738_v22, 0.0 }
 0x159   : > { %v798_v18 = vpop.f32.mrf.mxu1 }
 0x15a   : > { %v807_v19 = vpack.c.bf16 %v798_v18, %v796_v10 }
 0x15c   : > { %1473 = vmatmul.msk.bf16.gmra.mxu2 %vm833_vm8, %v807_v19  ;;  %1476 = vmatmul.msk.bf16.gmra.mxu3 %vm833_vm8, %v807_v19 }
 0x15d   : > { %v739_v23 = vpop.f32.mrf.mxu0 }
 0x15e   : > { %v740_v25 = vadd.f32 %v1620_v58, %v739_v23 }
 0x160   : > { %v747_v26 = vmax.f32 %v740_v25, 0.0 }
 0x162   : > { %v893_v29 = vpack.c.bf16 %v747_v26, %v746_v24  ;;  %v1602_v26 = vld [vmem:[%s1762_s25 + $0x8] sm:$0xff] }
 0x163   : > { %1609 = vmatpush.bf16.msra.mxu3 %v1602_v26  ;;  %1190 = vmatpush.bf16.msra.mxu0 %v1602_v26 }
 0x164   : > { %1480 = vmatmul.msk.bf16.gmra.mxu0 %vm704_vm6, %v893_v29  ;;  %1483 = vmatmul.msk.bf16.gmra.mxu1 %vm704_vm6, %v893_v29 }
 0x167   : > { %1610 = vmatpush.bf16.msra.mxu3 %v1601_v28  ;;  %1191 = vmatpush.bf16.msra.mxu0 %v1601_v28 }
 0x16c   : > { %1474 = vmatmul.msk.bf16.gmra.mxu2 %vm833_vm8, %v808_v30  ;;  %1477 = vmatmul.msk.bf16.gmra.mxu3 %vm833_vm8, %v808_v30 }
 0x174   : > { %1556 = vmatmul.msk.bf16.vlgmr.msra.gmra.mxu0 %vm833_vm8, %v1811_v32  ;;  %v1600_v32 = vld [vmem:[#allocation4] sm:$0xff] }
 0x1c1   : > { %v924_v42 = vpop.f32.mrf.mxu0  ;;  %v948_v43 = vpop.f32.mrf.mxu1 }
 0x1c9   : > { %v926_v46 = vpop.f32.mrf.mxu0  ;;  %v950_v47 = vpop.f32.mrf.mxu1 }
 0x1cf   : > { %v852_v44 = vpop.f32.mrf.mxu2  ;;  %v876_v45 = vpop.f32.mrf.mxu3 }
 0x1d0   : > { %v963_v50 = vmul.f32 %v924_v42, %v852_v44  ;;  %v964_v51 = vmul.f32 %v948_v43, %v876_v45 }
 0x1d1   : > { %v929_v54 = vpop.f32.mrf.mxu0  ;;  %v953_v55 = vpop.f32.mrf.mxu1 }
 0x1d7   : > { %v854_v48 = vpop.f32.mrf.mxu2  ;;  %v878_v49 = vpop.f32.mrf.mxu3 }
 0x1d8   : > { %v965_v52 = vmul.f32 %v926_v46, %v854_v48  ;;  %v966_v53 = vmul.f32 %v950_v47, %v878_v49 }
 0x1d9   : > { %v931_v60 = vpop.f32.mrf.mxu0  ;;  %v955_v61 = vpop.f32.mrf.mxu1 }
 0x1da   : > { %v975_v56 = vpack.c.bf16 %v965_v52, %v963_v50  ;;  %v976_v57 = vpack.c.bf16 %v966_v53, %v964_v51  ;;  %v1621_v50 = vld [vmem:[%s1972_s19] ss:$0 sm:$0xff] }
 0x1dc   : > { %1117 = vmatmul.bf16.vlgmr.msra.gmra.mxu2 %v975_v56  ;;  %1141 = vmatmul.bf16.vlgmr.msrb.gmra.mxu3 %v976_v57 }
 0x1df   : > { %v857_v58 = vpop.f32.mrf.mxu2  ;;  %v881_v59 = vpop.f32.mrf.mxu3 }
 0x1e0   : > { %v967_v0 = vmul.f32 %v929_v54, %v857_v58  ;;  %v968_v1 = vmul.f32 %v953_v55, %v881_v59 }
 0x1e1   : > { %v934_v6 = vpop.f32.mrf.mxu0  ;;  %v958_v7 = vpop.f32.mrf.mxu1 }
 0x1e7   : > { %v859_v62 = vpop.f32.mrf.mxu2  ;;  %v883_v63 = vpop.f32.mrf.mxu3 }
 0x1e8   : > { %v969_v2 = vmul.f32 %v931_v60, %v859_v62  ;;  %v970_v3 = vmul.f32 %v955_v61, %v883_v63 }
 0x1e9   : > { %v936_v10 = vpop.f32.mrf.mxu0  ;;  %v960_v11 = vpop.f32.mrf.mxu1 }
 0x1ea   : > { %v977_v4 = vpack.c.bf16 %v969_v2, %v967_v0  ;;  %v978_v5 = vpack.c.bf16 %v970_v3, %v968_v1 }
 0x1ec   : > { %1122 = vmatmul.bf16.gmra.mxu2 %v977_v4  ;;  %1146 = vmatmul.bf16.gmra.mxu3 %v978_v5 }
 0x1ef   : > { %v862_v8 = vpop.f32.mrf.mxu2  ;;  %v886_v9 = vpop.f32.mrf.mxu3 }
 0x1f0   : > { %v971_v14 = vmul.f32 %v934_v6, %v862_v8  ;;  %v972_v15 = vmul.f32 %v958_v7, %v886_v9 }
 0x1f1   : > { %v1193_v49 = vpop.f32.mrf.mxu0 }
 0x1f7   : > { %v864_v12 = vpop.f32.mrf.mxu2  ;;  %v888_v13 = vpop.f32.mrf.mxu3 }
 0x1f8   : > { %v973_v16 = vmul.f32 %v936_v10, %v864_v12  ;;  %v974_v17 = vmul.f32 %v960_v11, %v888_v13 }
 0x1f9   : > { %v1195_v54 = vpop.f32.mrf.mxu0 }
 0x1fa   : > { %v979_v18 = vpack.c.bf16 %v973_v16, %v971_v14  ;;  %v980_v19 = vpack.c.bf16 %v974_v17, %v972_v15 }
 0x1fc   : > { %1127 = vmatmul.bf16.gmra.mxu2 %v979_v18  ;;  %1151 = vmatmul.bf16.gmra.mxu3 %v980_v19 }
 0x20c   : > { %1557 = vmatmul.msk.bf16.vlgmr.msra.gmra.mxu3 %vm833_vm8, %v1804_v27  ;;  %v1159_v27 = vld [vmem:[#allocation4 + $0x8] sm:$0xf] }
 0x20d   : > { %v1207_v45 = vunpack.c.l.b16 %v1159_v27 }
 0x20f   : > { %v1209_v46 = vpack.c.b16 %v1207_v45, %v1207_v45 }
 0x25f   : > { %v1118_v20 = vpop.f32.mrf.mxu2  ;;  %v1142_v21 = vpop.f32.mrf.mxu3 }
 0x260   : > { %v1143_v43 = vadd.f32 %v1142_v21, %v1118_v20 }
 0x267   : > { %v1120_v22 = vpop.f32.mrf.mxu2  ;;  %v1144_v23 = vpop.f32.mrf.mxu3 }
 0x268   : > { %v1145_v41 = vadd.f32 %v1144_v23, %v1120_v22 }
 0x26a   : > { %v1160_v44 = vpack.c.bf16 %v1145_v41, %v1143_v43 }
 0x26f   : > { %v1123_v24 = vpop.f32.mrf.mxu2  ;;  %v1147_v25 = vpop.f32.mrf.mxu3 }
 0x270   : > { %v1148_v40 = vadd.f32 %v1147_v25, %v1123_v24 }
 0x277   : > { %v1125_v29 = vpop.f32.mrf.mxu2  ;;  %v1149_v30 = vpop.f32.mrf.mxu3 }
 0x278   : > { %v1150_v38 = vadd.f32 %v1149_v30, %v1125_v29 }
 0x27a   : > { %v1161_v42 = vpack.c.bf16 %v1150_v38, %v1148_v40 }
 0x27f   : > { %v1128_v31 = vpop.f32.mrf.mxu2  ;;  %v1152_v33 = vpop.f32.mrf.mxu3 }
 0x280   : > { %v1153_v36 = vadd.f32 %v1152_v33, %v1128_v31 }
 0x287   : > { %v1130_v34 = vpop.f32.mrf.mxu2  ;;  %v1154_v35 = vpop.f32.mrf.mxu3 }
 0x288   : > { %v1155_v37 = vadd.f32 %v1154_v35, %v1130_v34 }
 0x28a   : > { %v1162_v39 = vpack.c.bf16 %v1155_v37, %v1153_v36 }
 0x28c   : > { %1222 = vmatpush.bf16.msra.mxu1 %v1162_v39 }
 0x28f   : > { %v1198_v47 = vpop.f32.mrf.mxu3 }
 0x290   : > { %1223 = vmatpush.bf16.msra.mxu1 %v1161_v42 }
 0x294   : > { %1224 = vmatpush.bf16.msra.mxu1 %v1160_v44 }
 0x297   : > { %1562 = vmatmul.msk.bf16.vlgmr.msra.gmra.mxu1 %vm1210_vm9, %v1600_v32  ;;  %v1200_v48 = vpop.f32.mrf.mxu3 }
 0x2a7   : > { %1563 = vmatmul.msk.bf16.gmra.mxu1 %vm1210_vm9, %v1209_v46 }
 0x314   : > { %v1226_v51 = vpop.f32.mrf.mxu1 }
 0x315   : > { %v1227_v52 = vadd.f32 %v1226_v51, %v1193_v49 }
 0x317   : > { %v1239_v53 = vadd.f32 %v1621_v50, %v1227_v52 }
 0x31c   : > { %v1228_v55 = vpop.f32.mrf.mxu1 }
 0x31d   : > { %v1229_v56 = vadd.f32 %v1228_v55, %v1195_v54 }
 0x31f   : > { %v1240_v57 = vadd.f32 %v1621_v50, %v1229_v56 }
 0x324   : > { %v1231_v58 = vpop.f32.mrf.mxu1 }
 0x325   : > { %v1232_v59 = vadd.f32 %v1231_v58, %v1198_v47 }
 0x327   : > { %v1241_v60 = vadd.f32 %v1621_v50, %v1232_v59 }
 0x328   : > { %1245 = sbr.rel (%p1564_p5) target bundleno = 819 (0x333), region = 129 }
 0x32c   : > { %v1233_v61 = vpop.f32.mrf.mxu1 }
 0x32d   : > { %vm1246_vm10 = vcmp.gt.f32.partialorder %v1239_v53, 0.0  ;;  %v1249_v62 = vmul.f32 0.01, %v1239_v53  ;;  %vm1247_vm11 = vcmp.gt.f32.partialorder %v1240_v57, 0.0  ;;  %v1250_v63 = vmul.f32 0.01, %v1240_v57 }
 0x32e   : > { %vm1248_vm12 = vcmp.gt.f32.partialorder %v1241_v60, 0.0  ;;  %v1251_v0 = vmul.f32 0.01, %v1241_v60 }
 0x32f   : > { %v1252_v1 = vsel %vm1246_vm10, %v1239_v53, %v1249_v62  ;;  %v1253_v2 = vsel %vm1247_vm11, %v1240_v57, %v1250_v63 }
 0x330   : > { %1255 = vst.msk [vmem:[#allocation2] sm:$0xff] %vm833_vm8, %v1252_v1  ;;  %v1254_v3 = vsel %vm1248_vm12, %v1241_v60, %v1251_v0 }
 0x331   : > { %1256 = vst.msk [vmem:[#allocation2 + $0x8] sm:$0xff] %vm833_vm8, %v1253_v2 }
 0x332   : > { %1257 = vst.msk [vmem:[#allocation2 + $0x10] sm:$0xff] %vm833_vm8, %v1254_v3 }
 0x333 PF: > { %p1565_p6 = scmp.ne.s32.totalorder %s1734_s26, 1 }
 0x334   : > { %s1973_s18 = sld [smem:[#allocation14_spill]] (!%p1565_p6) }
 0x335   : > { %1261 = sbr.rel (%p1565_p6) target bundleno = 1091 (0x443), region = 133 }
 0x33a   : > { %v1264_v4 = vpack.c.bf16 %v1241_v60, %v1241_v60  ;;  %v1287_v5 = vld [vmem:[%s1955_s10 + $0x18] sm:$0xff]  ;;  %v1286_v6 = vld [vmem:[%s1955_s10 + $0x10] sm:$0xff]  ;;  %v1285_v8 = vld [vmem:[%s1955_s10 + $0x8] sm:$0xff]  ;;  %v1263_v9 = vpack.c.bf16 %v1240_v57, %v1239_v53  ;;  %vm1315_vm13 = vcmask 1024  }
 0x33b   : > { %1307 = vmatpush.msra.mxu1 %v1287_v5  ;;  %v1262_v10 = vld [vmem:[%s1954_s9] sm:$0x1]  ;;  %v1622_v14 = vld [vmem:[#allocation6] ss:$0 sm:$0xff] }
 0x33c   : > { %v1269_v7 = vsel %vm714_vm5, %v1264_v4, 0  ;;  %v1284_v11 = vld [vmem:[%s1955_s10] sm:$0xff] }
 0x33d   : > { %1277 = vmatpush.bf16.msra.mxu0 %v1269_v7  ;;  %1308 = vmatpush.msra.mxu1 %v1286_v6 }
 0x33f   : > { %1309 = vmatpush.msra.mxu1 %v1285_v8 }
 0x341   : > { %1278 = vmatpush.bf16.msra.mxu0 %v1263_v9  ;;  %1310 = vmatpush.msra.mxu1 %v1284_v11 }
 0x344   : > { %1566 = vmatmul.msk.bf16.vlgmr.msra.gmra.mxu0 %vm769_vm7, %v1262_v10 }
 0x3c1   : > { %v1280_v12 = vpop.f32.mrf.mxu0 }
 0x3c2   : > { %1567 = vmatmul.msk.f32.vlgmr.msra.gmra.mxu1 %vm833_vm8, %v1280_v12 }
 0x3c9   : > { %v1282_v13 = vpop.f32.mrf.mxu0 }
 0x43f   : > { %v1312_v15 = vpop.f32.mrf.mxu1 }
 0x440   : > { %v1313_v16 = vadd.f32 %v1622_v14, %v1312_v15 }
 0x442   : > { %1316 = vst.msk [vmem:[%s1973_s18] sm:$0x3] %vm1315_vm13, %v1313_v16 }
 0x443 PF: > { %s1974_s25 = sld [smem:[#allocation11_spill]] }
 0x449   : > { %s29_s25 = sadd.s32 1, %s1974_s25  }
 0x44a   : > { %p26_p7 = scmp.ge.s32.totalorder %s29_s25, 4  }
 0x44c   :  { %28 = sbr.rel (!%p26_p7) target bundleno = 4 (0x4), region = 187 }
 0x451   :  { %1328 = vsyncmov [#allocation5] }
 0x454   :  { %s1329_s1 = vpop.sfrf %1328 }
 0x455   :  { %p1570_p8 = scmp.ne.s32.totalorder %s1329_s1, 0 }
 0x457   :  { %1333 = shalt.err (%p1570_p8)  }
 0x458   :  { %1335 = vsyncmov [#allocation5 + $0x1] }
 0x45b   :  { %s1336_s19 = vpop.sfrf %1335 }
 0x45c   :  { %p1571_p9 = scmp.ne.s32.totalorder %s1336_s19, 0 }
 0x45e   :  { %1340 = shalt.err (%p1571_p9)  }

</bundles_post_ra>
